<compile_context>
chip_gen: v7x
topology: tpu7x:2x2x1
jax: 0.10.0
libtpu: 0.0.40
codegen_flags: <defaults>
</compile_context>

<pallas_src>
import math

import jax
import jax.numpy as jnp
from jax import lax
from jax.experimental import pallas as pl
from jax.experimental.pallas import tpu as pltpu


def _round_up(n, m):
    return ((n + m - 1) // m) * m


# ----------------------------------------------------------------------------
# Fused kernel factory
# ----------------------------------------------------------------------------

def _make_mlp_kernel(dims, pdims, eps=1e-5):
    """Fused MLP kernel for the given (real, padded) layer dims.

    Ref layout: x_ref, then per intermediate layer (w, gamma, beta),
    then final w, then o_ref.  Layers are unrolled at trace time.
    """
    n_layers = len(dims) - 1
    inv_sqrt2 = 1.0 / math.sqrt(2.0)

    def kernel(*refs):
        x = refs[0][...]
        idx = 1
        for li in range(n_layers):
            last = (li == n_layers - 1)
            w = refs[idx][...]
            idx += 1
            # MXU matmul in the weight's storage dtype, f32 accumulation.
            y = jnp.dot(x.astype(w.dtype), w, preferred_element_type=jnp.float32)
            if not last:
                g = refs[idx][...]
                b = refs[idx + 1][...]
                idx += 2
                # erf-based GELU (matches PyTorch / BERT gelu), f32.
                y = 0.5 * y * (1.0 + lax.erf(y * inv_sqrt2))
                # LayerNorm over the REAL feature width.  Padded lanes of y
                # are exactly 0 (zero-padded weight cols -> 0 -> GELU(0)=0),
                # so the unmasked sums are already exact; variance via
                # E[y^2] - mean^2 avoids the per-lane mask entirely.
                inv_d = 1.0 / float(dims[li + 1])
                mean = jnp.sum(y, axis=-1, keepdims=True) * inv_d
                msq = jnp.sum(y * y, axis=-1, keepdims=True) * inv_d
                var = jnp.maximum(msq - mean * mean, 0.0)
                y = (y - mean) * lax.rsqrt(var + eps)
                # Padded gamma/beta lanes are 0, so padded lanes return to 0.
                y = y * g + b
            x = y
        refs[-1][...] = x.astype(refs[-1].dtype)

    return kernel


# ----------------------------------------------------------------------------
# Parameter preparation: pad ONCE to lane-dense shapes (cache across calls)
# ----------------------------------------------------------------------------

def prepare_mlp_params(params, compute_dtype=None):
    """Pad weights/gamma/beta to 128-multiples once; returns kernel-ready state.

    params: list of dicts; intermediate layers have 'w','gamma','beta',
    the last layer has only 'w'.  'w' is stored as (d_in, d_out) == W.T.
    compute_dtype: optionally cast weights (e.g. jnp.bfloat16 on v6e/v7x).
    """
    n_layers = len(params)
    dims = [params[0]["w"].shape[0]] + [p["w"].shape[1] for p in params]
    pdims = [_round_up(d, 128) for d in dims]

    flat = []
    for li, p in enumerate(params):
        d_in, d_out = p["w"].shape
        pi, po = pdims[li], pdims[li + 1]
        w = p["w"].astype(compute_dtype) if compute_dtype is not None else p["w"]
        flat.append(jnp.pad(w, ((0, pi - d_in), (0, po - d_out))))
        if li < n_layers - 1:
            g = p["gamma"].reshape(1, d_out)
            b = p["beta"].reshape(1, d_out)
            flat.append(jnp.pad(g, ((0, 0), (0, po - d_out))))
            flat.append(jnp.pad(b, ((0, 0), (0, po - d_out))))

    weight_bytes = sum(int(a.size) * int(a.dtype.itemsize) for a in flat)
    return {"flat": flat, "dims": dims, "pdims": pdims,
            "weight_bytes": weight_bytes}


# ----------------------------------------------------------------------------
# Batch-tile heuristic (dtype-aware sublane packing, spill-aware cap)
# ----------------------------------------------------------------------------

def _batch_tile(B, pdims, act_dtype):
    itemsize = jnp.dtype(act_dtype).itemsize
    sub = {4: 8, 2: 16, 1: 32}.get(itemsize, 8)
    max_pd = max(pdims)
    if max_pd >= 2048:
        cap = 128          # keep live (TB, d_pad) f32 temporaries small
    elif max_pd >= 1024:
        cap = 256
    else:
        cap = 512          # amortize ~0.35us/step overhead for small widths
    # cdiv(B, 2): >= 2 grid steps whenever the batch allows, so the
    # "parallel" axis can shard across both v7x TensorCores.
    tb = min(cap, max(int(pl.cdiv(B, 2)), 1))
    return _round_up(tb, sub)


# ----------------------------------------------------------------------------
# Forward: single fused pallas_call, weights VMEM-resident
# ----------------------------------------------------------------------------

def mlp_forward(x, prepared):
    dims, pdims = prepared["dims"], prepared["pdims"]
    flat, weight_bytes = prepared["flat"], prepared["weight_bytes"]
    n_layers = len(dims) - 1

    B, d0 = x.shape
    assert d0 == dims[0], "input feature dim mismatch"
    act_dtype = x.dtype
    act_bytes = jnp.dtype(act_dtype).itemsize

    TB = _batch_tile(B, pdims, act_dtype)
    B_pad = _round_up(B, TB)
    x_p = jnp.pad(x, ((0, B_pad - B), (0, pdims[0] - d0)))

    kernel = _make_mlp_kernel(dims, pdims)
    grid = (B_pad // TB,)

    # Advisory cost estimate so XLA can overlap this op with neighbours.
    flops = 2 * B_pad * sum(pdims[i] * pdims[i + 1] for i in range(n_layers))
    transc = B_pad * int(sum(pdims[1:-1]))          # one erf per hidden elem
    bytes_accessed = (int(x_p.size) + B_pad * pdims[-1]) * act_bytes + weight_bytes
    cost = pl.CostEstimate(flops=int(flops), transcendentals=int(transc),
                           bytes_accessed=int(bytes_accessed))

    def build(single_buffer_weights):
        def const_spec(shape):
            # Constant-index blocks: single-buffer when supported (halves the
            # resident weight VMEM footprint; block never changes).
            if single_buffer_weights:
                return pl.BlockSpec(shape, lambda i: (0, 0),
                                    pipeline_mode=pl.Buffered(1))
            return pl.BlockSpec(shape, lambda i: (0, 0))

        in_specs = [pl.BlockSpec((TB, pdims[0]), lambda i: (i, 0))]
        for li in range(n_layers):
            in_specs.append(const_spec((pdims[li], pdims[li + 1])))
            if li < n_layers - 1:
                in_specs.append(const_spec((1, pdims[li + 1])))
                in_specs.append(const_spec((1, pdims[li + 1])))
        out_specs = pl.BlockSpec((TB, pdims[-1]), lambda i: (i, 0))

        # Explicit scoped-VMEM budget: resident weights (x buffer count)
        # + double-buffered x/out tiles + live f32 temporaries, with headroom.
        wbuf = weight_bytes * (1 if single_buffer_weights else 2)
        io = 2 * (TB * pdims[0] + TB * pdims[-1]) * act_bytes
        tmp = 4 * TB * max(pdims) * 4
        vmem_limit = int(min(max((wbuf + io + tmp) * 3 // 2, 32 << 20), 100 << 20))

        return pl.pallas_call(
            kernel,
            out_shape=jax.ShapeDtypeStruct((B_pad, pdims[-1]), act_dtype),
            grid_spec=pltpu.PrefetchScalarGridSpec(
                num_scalar_prefetch=0,
                grid=grid,
                in_specs=in_specs,
                out_specs=out_specs,
            ),
            compiler_params=pltpu.CompilerParams(
                dimension_semantics=("parallel",),
                vmem_limit_bytes=vmem_limit,
            ),
            cost_estimate=cost,
        )

    inputs = [x_p] + list(flat)
    try:
        out_p = jax.block_until_ready(build(True)(*inputs))
    except Exception:
        # pipeline_mode=pl.Buffered(1) not honoured on this JAX/Mosaic build;
        # fall back to default double-buffering (correctness identical).
        out_p = build(False)(*inputs)

    return out_p[:B, :dims[-1]]


# ----------------------------------------------------------------------------
# Parameter init (matches the module's shapes; nn.Linear bias=False)
# ----------------------------------------------------------------------------

def init_mlp_params(key, input_sizes, dtype=jnp.float32):
    """nn.Linear(d_in, d_out, bias=False) -> weight (d_out, d_in); we store W.T."""
    params = []
    n_layers = len(input_sizes) - 1
    for i in range(1, len(input_sizes)):
        d_in, d_out = input_sizes[i - 1], input_sizes[i]
        key, wk = jax.random.split(key)
        bound = 1.0 / math.sqrt(d_in)
        w_t = jax.random.uniform(wk, (d_in, d_out), dtype=dtype,
                                 minval=-bound, maxval=bound)
        layer = {"w": w_t}
        if i < len(input_sizes) - 1 and n_layers > 1:
            # nn.LayerNorm default init: gamma=1, beta=0
            layer["gamma"] = jnp.ones((d_out,), dtype=dtype)
            layer["beta"] = jnp.zeros((d_out,), dtype=dtype)
        params.append(layer)
    return params


# ----------------------------------------------------------------------------
# Reference (pure JAX) for a sanity check
# ----------------------------------------------------------------------------

def mlp_reference(x, params):
    n = len(params)
    for i, p in enumerate(params):
        x = x @ p["w"]
        if i < n - 1:
            x = 0.5 * x * (1.0 + lax.erf(x / jnp.sqrt(2.0)))
            mean = jnp.mean(x, axis=-1, keepdims=True)
            var = jnp.mean((x - mean) ** 2, axis=-1, keepdims=True)
            x = (x - mean) * lax.rsqrt(var + 1e-5)
            x = x * p["gamma"] + p["beta"]
    return x


if __name__ == "__main__":
    key = jax.random.PRNGKey(0)
    input_sizes = [32, 64, 32]          # MLP([32, 64, 32], bias=False)
    batch = 8

    kx, kp = jax.random.split(key)
    x = jax.random.normal(kx, (batch, input_sizes[0]), dtype=jnp.float32)
    params = init_mlp_params(kp, input_sizes)

    # Pad/cast parameters ONCE (kernel-ready, cached across forward calls).
    prepared = prepare_mlp_params(params)   # compute_dtype=jnp.bfloat16 on v6e/v7x

    out = mlp_forward(x, prepared)
    out = jax.block_until_ready(out)

    ref = mlp_reference(x, params)
    assert out.shape == (batch, input_sizes[-1])
    assert jnp.allclose(out, ref, atol=1e-4, rtol=1e-4), "mismatch vs reference"

    print("KERNEL_OK")
</pallas_src>

<mosaic_0001>
module attributes {stable_mosaic.version = 11 : i64} {
  func.func @kernel(%arg0: i32, %arg1: memref<8x128xf32, #tpu.memory_space<vmem>>, %arg2: memref<128x128xf32, #tpu.memory_space<vmem>>, %arg3: memref<1x128xf32, #tpu.memory_space<vmem>>, %arg4: memref<1x128xf32, #tpu.memory_space<vmem>>, %arg5: memref<128x128xf32, #tpu.memory_space<vmem>>, %arg6: memref<8x128xf32, #tpu.memory_space<vmem>>) attributes {dimension_semantics = [#tpu.dimension_semantics<parallel>], iteration_bounds = array<i64: 1>, scalar_prefetch = 0 : i64, scratch_operands = 0 : i64, tpu.core_type = #tpu.core_type<tc>, window_params = [{transform_indices = @transform_0, window_bounds = array<i64: 8, 128>}, {pipeline_mode = #tpu.pipeline_mode<synchronous>, transform_indices = @transform_1, window_bounds = array<i64: 128, 128>}, {pipeline_mode = #tpu.pipeline_mode<synchronous>, transform_indices = @transform_2, window_bounds = array<i64: 1, 128>}, {pipeline_mode = #tpu.pipeline_mode<synchronous>, transform_indices = @transform_3, window_bounds = array<i64: 1, 128>}, {pipeline_mode = #tpu.pipeline_mode<synchronous>, transform_indices = @transform_4, window_bounds = array<i64: 128, 128>}, {transform_indices = @transform_5, window_bounds = array<i64: 8, 128>}]} {
    %c0 = arith.constant 0 : index
    %c0_0 = arith.constant 0 : index
    %0 = vector.load %arg1[%c0, %c0_0] : memref<8x128xf32, #tpu.memory_space<vmem>>, vector<8x128xf32>
    %c0_1 = arith.constant 0 : index
    %c0_2 = arith.constant 0 : index
    %1 = vector.load %arg2[%c0_1, %c0_2] : memref<128x128xf32, #tpu.memory_space<vmem>>, vector<128x128xf32>
    %cst = arith.constant dense<0.000000e+00> : vector<8x128xf32>
    %2 = tpu.matmul %0, %1, %cst {dimension_numbers = #tpu.dot_dimension_numbers<[1], [0], [0], [1], [0, 0, 1, 1], [], []>} : vector<8x128xf32>, vector<128x128xf32>, vector<8x128xf32> -> vector<8x128xf32>
    %c0_3 = arith.constant 0 : index
    %c0_4 = arith.constant 0 : index
    %3 = vector.load %arg3[%c0_3, %c0_4] : memref<1x128xf32, #tpu.memory_space<vmem>>, vector<1x128xf32>
    %c0_5 = arith.constant 0 : index
    %c0_6 = arith.constant 0 : index
    %4 = vector.load %arg4[%c0_5, %c0_6] : memref<1x128xf32, #tpu.memory_space<vmem>>, vector<1x128xf32>
    %cst_7 = arith.constant 5.000000e-01 : f32
    %5 = vector.broadcast %cst_7 : f32 to vector<8x128xf32>
    %6 = arith.mulf %5, %2 : vector<8x128xf32>
    %cst_8 = arith.constant 0.707106769 : f32
    %7 = vector.broadcast %cst_8 : f32 to vector<8x128xf32>
    %8 = arith.mulf %2, %7 : vector<8x128xf32>
    %9 = math.erf %8 : vector<8x128xf32>
    %cst_9 = arith.constant 1.000000e+00 : f32
    %10 = vector.broadcast %cst_9 : f32 to vector<8x128xf32>
    %11 = arith.addf %10, %9 : vector<8x128xf32>
    %12 = arith.mulf %6, %11 : vector<8x128xf32>
    %cst_10 = arith.constant dense<0.000000e+00> : vector<8xf32>
    %13 = vector.multi_reduction <add>, %12, %cst_10 [1] : vector<8x128xf32> to vector<8xf32>
    %14 = vector.shape_cast %13 : vector<8xf32> to vector<8x1xf32>
    %cst_11 = arith.constant 1.562500e-02 : f32
    %15 = vector.broadcast %cst_11 : f32 to vector<8x1xf32>
    %16 = arith.mulf %14, %15 : vector<8x1xf32>
    %17 = arith.mulf %12, %12 : vector<8x128xf32>
    %cst_12 = arith.constant dense<0.000000e+00> : vector<8xf32>
    %18 = vector.multi_reduction <add>, %17, %cst_12 [1] : vector<8x128xf32> to vector<8xf32>
    %19 = vector.shape_cast %18 : vector<8xf32> to vector<8x1xf32>
    %cst_13 = arith.constant 1.562500e-02 : f32
    %20 = vector.broadcast %cst_13 : f32 to vector<8x1xf32>
    %21 = arith.mulf %19, %20 : vector<8x1xf32>
    %22 = arith.mulf %16, %16 : vector<8x1xf32>
    %23 = arith.subf %21, %22 : vector<8x1xf32>
    %cst_14 = arith.constant 0.000000e+00 : f32
    %24 = vector.broadcast %cst_14 : f32 to vector<8x1xf32>
    %25 = arith.maximumf %23, %24 : vector<8x1xf32>
    %26 = vector.broadcast %16 : vector<8x1xf32> to vector<8x128xf32>
    %27 = arith.subf %12, %26 : vector<8x128xf32>
    %cst_15 = arith.constant 9.99999974E-6 : f32
    %28 = vector.broadcast %cst_15 : f32 to vector<8x1xf32>
    %29 = arith.addf %25, %28 : vector<8x1xf32>
    %30 = math.rsqrt %29 : vector<8x1xf32>
    %31 = vector.broadcast %30 : vector<8x1xf32> to vector<8x128xf32>
    %32 = arith.mulf %27, %31 : vector<8x128xf32>
    %33 = vector.broadcast %3 : vector<1x128xf32> to vector<8x128xf32>
    %34 = arith.mulf %32, %33 : vector<8x128xf32>
    %35 = vector.broadcast %4 : vector<1x128xf32> to vector<8x128xf32>
    %36 = arith.addf %34, %35 : vector<8x128xf32>
    %c0_16 = arith.constant 0 : index
    %c0_17 = arith.constant 0 : index
    %37 = vector.load %arg5[%c0_16, %c0_17] : memref<128x128xf32, #tpu.memory_space<vmem>>, vector<128x128xf32>
    %cst_18 = arith.constant dense<0.000000e+00> : vector<8x128xf32>
    %38 = tpu.matmul %36, %37, %cst_18 {dimension_numbers = #tpu.dot_dimension_numbers<[1], [0], [0], [1], [0, 0, 1, 1], [], []>} : vector<8x128xf32>, vector<128x128xf32>, vector<8x128xf32> -> vector<8x128xf32>
    %c0_19 = arith.constant 0 : index
    %c0_20 = arith.constant 0 : index
    %39 = vector.load %arg6[%c0_19, %c0_20] : memref<8x128xf32, #tpu.memory_space<vmem>>, vector<8x128xf32>
    tpu.vector_store %arg6[%c0_19, %c0_20], %38 {strides = array<i32>} : memref<8x128xf32, #tpu.memory_space<vmem>>, vector<8x128xf32>,
    return
  }
  func.func @transform_0(%arg0: i32) -> (i32, i32) {
    %c0_i32 = arith.constant 0 : i32
    %c0_i32_0 = arith.constant 0 : i32
    return %arg0, %c0_i32 : i32, i32
  }
  func.func @transform_1(%arg0: i32) -> (i32, i32) {
    %c0_i32 = arith.constant 0 : i32
    %c0_i32_0 = arith.constant 0 : i32
    %c0_i32_1 = arith.constant 0 : i32
    return %c0_i32, %c0_i32_0 : i32, i32
  }
  func.func @transform_2(%arg0: i32) -> (i32, i32) {
    %c0_i32 = arith.constant 0 : i32
    %c0_i32_0 = arith.constant 0 : i32
    %c0_i32_1 = arith.constant 0 : i32
    return %c0_i32, %c0_i32_0 : i32, i32
  }
  func.func @transform_3(%arg0: i32) -> (i32, i32) {
    %c0_i32 = arith.constant 0 : i32
    %c0_i32_0 = arith.constant 0 : i32
    %c0_i32_1 = arith.constant 0 : i32
    return %c0_i32, %c0_i32_0 : i32, i32
  }
  func.func @transform_4(%arg0: i32) -> (i32, i32) {
    %c0_i32 = arith.constant 0 : i32
    %c0_i32_0 = arith.constant 0 : i32
    %c0_i32_1 = arith.constant 0 : i32
    return %c0_i32, %c0_i32_0 : i32, i32
  }
  func.func @transform_5(%arg0: i32) -> (i32, i32) {
    %c0_i32 = arith.constant 0 : i32
    %c0_i32_0 = arith.constant 0 : i32
    return %arg0, %c0_i32 : i32, i32
  }
}

module attributes {stable_mosaic.version = 11 : i64} {
  func.func @kernel(%arg0: i32, %arg1: memref<8x128xf32, #tpu.memory_space<vmem>>, %arg2: memref<128x128xf32, #tpu.memory_space<vmem>>, %arg3: memref<1x128xf32, #tpu.memory_space<vmem>>, %arg4: memref<1x128xf32, #tpu.memory_space<vmem>>, %arg5: memref<128x128xf32, #tpu.memory_space<vmem>>, %arg6: memref<8x128xf32, #tpu.memory_space<vmem>>) attributes {dimension_semantics = [#tpu.dimension_semantics<parallel>], iteration_bounds = array<i64: 1>, scalar_prefetch = 0 : i64, scratch_operands = 0 : i64, tpu.core_type = #tpu.core_type<tc>, window_params = [{transform_indices = @transform_0, window_bounds = array<i64: 8, 128>}, {pipeline_mode = #tpu.pipeline_mode<synchronous>, transform_indices = @transform_1, window_bounds = array<i64: 128, 128>}, {pipeline_mode = #tpu.pipeline_mode<synchronous>, transform_indices = @transform_2, window_bounds = array<i64: 1, 128>}, {pipeline_mode = #tpu.pipeline_mode<synchronous>, transform_indices = @transform_3, window_bounds = array<i64: 1, 128>}, {pipeline_mode = #tpu.pipeline_mode<synchronous>, transform_indices = @transform_4, window_bounds = array<i64: 128, 128>}, {transform_indices = @transform_5, window_bounds = array<i64: 8, 128>}]} {
    %c0 = arith.constant 0 : index
    %c0_0 = arith.constant 0 : index
    %0 = vector.load %arg1[%c0, %c0_0] : memref<8x128xf32, #tpu.memory_space<vmem>>, vector<8x128xf32>
    %c0_1 = arith.constant 0 : index
    %c0_2 = arith.constant 0 : index
    %1 = vector.load %arg2[%c0_1, %c0_2] : memref<128x128xf32, #tpu.memory_space<vmem>>, vector<128x128xf32>
    %cst = arith.constant dense<0.000000e+00> : vector<8x128xf32>
    %2 = tpu.matmul %0, %1, %cst {dimension_numbers = #tpu.dot_dimension_numbers<[1], [0], [0], [1], [0, 0, 1, 1], [], []>} : vector<8x128xf32>, vector<128x128xf32>, vector<8x128xf32> -> vector<8x128xf32>
    %c0_3 = arith.constant 0 : index
    %c0_4 = arith.constant 0 : index
    %3 = vector.load %arg3[%c0_3, %c0_4] : memref<1x128xf32, #tpu.memory_space<vmem>>, vector<1x128xf32>
    %c0_5 = arith.constant 0 : index
    %c0_6 = arith.constant 0 : index
    %4 = vector.load %arg4[%c0_5, %c0_6] : memref<1x128xf32, #tpu.memory_space<vmem>>, vector<1x128xf32>
    %cst_7 = arith.constant 5.000000e-01 : f32
    %5 = vector.broadcast %cst_7 : f32 to vector<8x128xf32>
    %6 = arith.mulf %5, %2 : vector<8x128xf32>
    %cst_8 = arith.constant 0.707106769 : f32
    %7 = vector.broadcast %cst_8 : f32 to vector<8x128xf32>
    %8 = arith.mulf %2, %7 : vector<8x128xf32>
    %9 = math.erf %8 : vector<8x128xf32>
    %cst_9 = arith.constant 1.000000e+00 : f32
    %10 = vector.broadcast %cst_9 : f32 to vector<8x128xf32>
    %11 = arith.addf %10, %9 : vector<8x128xf32>
    %12 = arith.mulf %6, %11 : vector<8x128xf32>
    %cst_10 = arith.constant dense<0.000000e+00> : vector<8xf32>
    %13 = vector.multi_reduction <add>, %12, %cst_10 [1] : vector<8x128xf32> to vector<8xf32>
    %14 = vector.shape_cast %13 : vector<8xf32> to vector<8x1xf32>
    %cst_11 = arith.constant 1.562500e-02 : f32
    %15 = vector.broadcast %cst_11 : f32 to vector<8x1xf32>
    %16 = arith.mulf %14, %15 : vector<8x1xf32>
    %17 = arith.mulf %12, %12 : vector<8x128xf32>
    %cst_12 = arith.constant dense<0.000000e+00> : vector<8xf32>
    %18 = vector.multi_reduction <add>, %17, %cst_12 [1] : vector<8x128xf32> to vector<8xf32>
    %19 = vector.shape_cast %18 : vector<8xf32> to vector<8x1xf32>
    %cst_13 = arith.constant 1.562500e-02 : f32
    %20 = vector.broadcast %cst_13 : f32 to vector<8x1xf32>
    %21 = arith.mulf %19, %20 : vector<8x1xf32>
    %22 = arith.mulf %16, %16 : vector<8x1xf32>
    %23 = arith.subf %21, %22 : vector<8x1xf32>
    %cst_14 = arith.constant 0.000000e+00 : f32
    %24 = vector.broadcast %cst_14 : f32 to vector<8x1xf32>
    %25 = arith.maximumf %23, %24 : vector<8x1xf32>
    %26 = vector.broadcast %16 : vector<8x1xf32> to vector<8x128xf32>
    %27 = arith.subf %12, %26 : vector<8x128xf32>
    %cst_15 = arith.constant 9.99999974E-6 : f32
    %28 = vector.broadcast %cst_15 : f32 to vector<8x1xf32>
    %29 = arith.addf %25, %28 : vector<8x1xf32>
    %30 = math.rsqrt %29 : vector<8x1xf32>
    %31 = vector.broadcast %30 : vector<8x1xf32> to vector<8x128xf32>
    %32 = arith.mulf %27, %31 : vector<8x128xf32>
    %33 = vector.broadcast %3 : vector<1x128xf32> to vector<8x128xf32>
    %34 = arith.mulf %32, %33 : vector<8x128xf32>
    %35 = vector.broadcast %4 : vector<1x128xf32> to vector<8x128xf32>
    %36 = arith.addf %34, %35 : vector<8x128xf32>
    %c0_16 = arith.constant 0 : index
    %c0_17 = arith.constant 0 : index
    %37 = vector.load %arg5[%c0_16, %c0_17] : memref<128x128xf32, #tpu.memory_space<vmem>>, vector<128x128xf32>
    %cst_18 = arith.constant dense<0.000000e+00> : vector<8x128xf32>
    %38 = tpu.matmul %36, %37, %cst_18 {dimension_numbers = #tpu.dot_dimension_numbers<[1], [0], [0], [1], [0, 0, 1, 1], [], []>} : vector<8x128xf32>, vector<128x128xf32>, vector<8x128xf32> -> vector<8x128xf32>
    %c0_19 = arith.constant 0 : index
    %c0_20 = arith.constant 0 : index
    %39 = vector.load %arg6[%c0_19, %c0_20] : memref<8x128xf32, #tpu.memory_space<vmem>>, vector<8x128xf32>
    tpu.vector_store %arg6[%c0_19, %c0_20], %38 {strides = array<i32>} : memref<8x128xf32, #tpu.memory_space<vmem>>, vector<8x128xf32>,
    return
  }
  func.func @transform_0(%arg0: i32) -> (i32, i32) {
    %c0_i32 = arith.constant 0 : i32
    %c0_i32_0 = arith.constant 0 : i32
    return %arg0, %c0_i32 : i32, i32
  }
  func.func @transform_1(%arg0: i32) -> (i32, i32) {
    %c0_i32 = arith.constant 0 : i32
    %c0_i32_0 = arith.constant 0 : i32
    %c0_i32_1 = arith.constant 0 : i32
    return %c0_i32, %c0_i32_0 : i32, i32
  }
  func.func @transform_2(%arg0: i32) -> (i32, i32) {
    %c0_i32 = arith.constant 0 : i32
    %c0_i32_0 = arith.constant 0 : i32
    %c0_i32_1 = arith.constant 0 : i32
    return %c0_i32, %c0_i32_0 : i32, i32
  }
  func.func @transform_3(%arg0: i32) -> (i32, i32) {
    %c0_i32 = arith.constant 0 : i32
    %c0_i32_0 = arith.constant 0 : i32
    %c0_i32_1 = arith.constant 0 : i32
    return %c0_i32, %c0_i32_0 : i32, i32
  }
  func.func @transform_4(%arg0: i32) -> (i32, i32) {
    %c0_i32 = arith.constant 0 : i32
    %c0_i32_0 = arith.constant 0 : i32
    %c0_i32_1 = arith.constant 0 : i32
    return %c0_i32, %c0_i32_0 : i32, i32
  }
  func.func @transform_5(%arg0: i32) -> (i32, i32) {
    %c0_i32 = arith.constant 0 : i32
    %c0_i32_0 = arith.constant 0 : i32
    return %arg0, %c0_i32 : i32, i32
  }
}

</mosaic_0001>

<bundles_post_ra>
// kernel: tpu_custom_call.1
= control target key start
LH: loop header
LB: loop body
LE: loop exit
PB: predicated region body
PF: predicated region fallthrough
CT: control target
= control target key end

     0   :  { %10 = vsyncpa [#allocation3], 0  ;;  %s661_s0 = inlined_call_operand.hbm [shape: f32[8,128], index: 0, kind: input, shape index: {}]   ;;  %s662_s1 = inlined_call_operand.hbm [shape: f32[128,128], index: 1, kind: input, shape index: {}]   ;;  %s663_s2 = inlined_call_operand.vmem [shape: f32[1,128], index: 2, kind: input, shape index: {}]   ;;  %s664_s3 = inlined_call_operand.vmem [shape: f32[1,128], index: 3, kind: input, shape index: {}]   ;;  %s665_s4 = inlined_call_operand.hbm [shape: f32[128,128], index: 4, kind: input, shape index: {}]   ;;  %s666_s5 = inlined_call_operand.hbm [shape: f32[8,128], index: 5, kind: output, shape index: {}]  }
   0x1   :  { %11 = vsyncpa [#allocation6], 0 }
   0x2   :  { %12 = vsyncpa [#allocation4], 0  ;;  %s546_s18 = smov [#allocation5]   ;;  %s452_s22 = scalar_lea.hbm %s662_s1, 2048 }
   0x3   :  { %s28_s19 = sshll.u32 %s546_s18, 4  ;;  %p453_p0 = scmp.ne.s32.totalorder %s662_s1, %s452_s22  ;;  %s29_s19 = int_to_ptr.vmem [resolvable:$true] %s28_s19 }
   0x4   :  { %p456_p1 = scmp.lt.u32.totalorder %s452_s22, %s662_s1 }
   0x6   :  { %p458_p2 = pnand %p456_p1, %p453_p0 }
   0x8   :  { %461 = shalt.err (!%p458_p2)
}
   0x9   :  { %s462_s27 = scalar_lea.vmem %s29_s19, 2048  ;;  %p467_p4 = scmp.lt.s32.totalorder %s29_s19, %s29_s19 }
   0xa   :  { %p463_p3 = scmp.ne.s32.totalorder %s29_s19, %s462_s27  ;;  %p468_p5 = scmp.lt.s32.totalorder %s462_s27, %s462_s27 }
   0xc   :  { %p469_p6 = por %p468_p5, %p467_p4 }
   0xe   :  { %p470_p7 = pnand %p469_p6, %p463_p3 }
  0x10   :  { %473 = shalt.err (!%p470_p7)
}
  0x11   :  { %s547_s28 = smov 128   ;;  %s548_s29 = smov 8  }
  0x12   :  { %34 = dma.hbm_to_vmem [thread:$0]  %s662_s1, 2048, %s29_s19, [#allocation6], %s547_s28, %s547_s28, %s548_s29  }
  0x13   :  { %s549_s7 = smov [#allocation2]   ;;  %s550_s9 = smov [#allocation7]  }
  0x14   :  { %s19_s8 = sshll.u32 %s549_s7, 4  ;;  %s44_s10 = sshll.u32 %s550_s9, 4  ;;  %s20_s8 = int_to_ptr.vmem [resolvable:$true] %s19_s8  ;;  %s45_s10 = int_to_ptr.vmem [resolvable:$true] %s44_s10 }
  0x15   :  { %s474_s13 = scalar_lea.hbm %s661_s0, 128 }
  0x16   :  { %p475_p8 = scmp.ne.s32.totalorder %s661_s0, %s474_s13  ;;  %p478_p9 = scmp.lt.u32.totalorder %s474_s13, %s661_s0 }
  0x18   :  { %p480_p10 = pnand %p478_p9, %p475_p8 }
  0x1a   :  { %483 = shalt.err (!%p480_p10)
}
  0x1b   :  { %s484_s1 = scalar_lea.vmem %s20_s8, 128  ;;  %p489_p12 = scmp.lt.s32.totalorder %s20_s8, %s20_s8 }
  0x1c   :  { %p485_p11 = scmp.ne.s32.totalorder %s20_s8, %s484_s1  ;;  %p490_p13 = scmp.lt.s32.totalorder %s484_s1, %s484_s1 }
  0x1e   :  { %p491_p0 = por %p490_p13, %p489_p12 }
  0x20   :  { %p492_p1 = pnand %p491_p0, %p485_p11 }
  0x22   :  { %495 = shalt.err (!%p492_p1)
}
  0x23   :  { %22 = dma.hbm_to_vmem [thread:$0]  %s661_s0, 128, %s20_s8, [#allocation3]  }
  0x24   :  { %s496_s22 = scalar_lea.hbm %s665_s4, 2048 }
  0x25   :  { %p497_p2 = scmp.ne.s32.totalorder %s665_s4, %s496_s22  ;;  %p500_p3 = scmp.lt.u32.totalorder %s496_s22, %s665_s4 }
  0x27   :  { %p502_p4 = pnand %p500_p3, %p497_p2 }
  0x29   :  { %505 = shalt.err (!%p502_p4)
}
  0x2a   :  { %s506_s27 = scalar_lea.vmem %s45_s10, 2048  ;;  %p511_p6 = scmp.lt.s32.totalorder %s45_s10, %s45_s10 }
  0x2b   :  { %p507_p5 = scmp.ne.s32.totalorder %s45_s10, %s506_s27  ;;  %p512_p7 = scmp.lt.s32.totalorder %s506_s27, %s506_s27 }
  0x2d   :  { %p513_p8 = por %p512_p7, %p511_p6 }
  0x2f   :  { %p514_p9 = pnand %p513_p8, %p507_p5 }
  0x31   :  { %517 = shalt.err (!%p514_p9)
}
  0x32   :  { %50 = dma.hbm_to_vmem [thread:$0]  %s665_s4, 2048, %s45_s10, [#allocation6], %s547_s28, %s547_s28, %s548_s29  }
  0x33   :  { %540 = dma.done.wait [#allocation3], 128  }
  0x34   :  { %541 = vsyncadd [#allocation3], 4294967168 }
  0x35   :  { %542 = dma.done.wait [#allocation6], 4096  }
  0x36   :  { %543 = vsyncadd [#allocation6], 4294963200  ;;  %v551_v0 = vmov 0.0|0.0   ;;  %vm552_vm0 = vmmov 0   ;;  %v553_v1 = vmov 0.0   ;;  %v61_v2 = vld [vmem:[#allocation5] sm:$0xff] }
  0x37   :  { %391 = vmatprep.subr.bf16.mxu0 %v551_v0  ;;  %353 = vmatprep.mubr.msk.f32.mxu0 %vm552_vm0, %v553_v1  ;;  %v62_v3 = vld [vmem:[#allocation5 + $0x8] sm:$0xff]  ;;  %v63_v4 = vld [vmem:[#allocation5 + $0x10] sm:$0xff]  ;;  %v64_v6 = vld [vmem:[#allocation5 + $0x18] sm:$0xff]  ;;  %s554_s7 = smov [#allocation8]  }
  0x38   :  { %415 = vmatprep.subr.bf16.mxu1 %v551_v0  ;;  %388 = vmatprep.mubr.msk.f32.mxu1 %vm552_vm0, %v553_v1  ;;  %v392_v5 = vpack.c.bf16 %v62_v3, %v61_v2  ;;  %v395_v7 = vpack.c.bf16 %v64_v6, %v63_v4  ;;  %v65_v8 = vld [vmem:[#allocation5 + $0x20] sm:$0xff]  ;;  %v66_v9 = vld [vmem:[#allocation5 + $0x28] sm:$0xff]  ;;  %v67_v11 = vld [vmem:[#allocation5 + $0x30] sm:$0xff]  ;;  %s275_s8 = sshll.u32 %s554_s7, 4  ;;  %s276_s8 = int_to_ptr.vmem [resolvable:$true] %s275_s8 }
  0x39   :  { %v398_v10 = vpack.c.bf16 %v66_v9, %v65_v8  ;;  %v68_v12 = vld [vmem:[#allocation5 + $0x38] sm:$0xff]  ;;  %v69_v14 = vld [vmem:[#allocation5 + $0x40] sm:$0xff]  ;;  %v70_v15 = vld [vmem:[#allocation5 + $0x48] sm:$0xff]  ;;  %s518_s9 = scalar_lea.vmem %s276_s8, 128  ;;  %p523_p11 = scmp.lt.s32.totalorder %s276_s8, %s276_s8 }
  0x3a   :  { %393 = vmatpush3.bf16.msra.mxu0 %v392_v5  ;;  %v401_v13 = vpack.c.bf16 %v68_v12, %v67_v11  ;;  %v404_v16 = vpack.c.bf16 %v70_v15, %v69_v14  ;;  %v71_v17 = vld [vmem:[#allocation5 + $0x50] sm:$0xff]  ;;  %v72_v18 = vld [vmem:[#allocation5 + $0x58] sm:$0xff]  ;;  %v73_v20 = vld [vmem:[#allocation5 + $0x60] sm:$0xff]  ;;  %p519_p10 = scmp.ne.s32.totalorder %s276_s8, %s518_s9  ;;  %p524_p12 = scmp.lt.s32.totalorder %s518_s9, %s518_s9 }
  0x3b   :  { %394 = vmatprep.subr.bf16.mxu0 %v551_v0  ;;  %v407_v19 = vpack.c.bf16 %v72_v18, %v71_v17  ;;  %v74_v21 = vld [vmem:[#allocation5 + $0x68] sm:$0xff]  ;;  %v75_v23 = vld [vmem:[#allocation5 + $0x70] sm:$0xff]  ;;  %v76_v24 = vld [vmem:[#allocation5 + $0x78] sm:$0xff] }
  0x3c   :  { %v410_v22 = vpack.c.bf16 %v74_v21, %v73_v20  ;;  %v413_v25 = vpack.c.bf16 %v76_v24, %v75_v23  ;;  %v60_v26 = vld [vmem:[#allocation2] sm:$0xff]  ;;  %v182_v27 = vld [vmem:[#allocation7] sm:$0xff]  ;;  %v183_v28 = vld [vmem:[#allocation7 + $0x8] sm:$0xff]  ;;  %p525_p13 = por %p524_p12, %p523_p11 }
  0x3d   :  { %v416_v29 = vpack.c.bf16 %v183_v28, %v182_v27  ;;  %v184_v38 = vld [vmem:[#allocation7 + $0x10] sm:$0xff]  ;;  %v185_v39 = vld [vmem:[#allocation7 + $0x18] sm:$0xff]  ;;  %v186_v41 = vld [vmem:[#allocation7 + $0x20] sm:$0xff] }
  0x3e   :  { %396 = vmatpush3.bf16.msra.mxu0 %v395_v7  ;;  %v419_v40 = vpack.c.bf16 %v185_v39, %v184_v38  ;;  %v187_v42 = vld [vmem:[#allocation7 + $0x28] sm:$0xff]  ;;  %v188_v44 = vld [vmem:[#allocation7 + $0x30] sm:$0xff]  ;;  %v189_v45 = vld [vmem:[#allocation7 + $0x38] sm:$0xff]  ;;  %p526_p0 = pnand %p525_p13, %p519_p10 }
  0x3f   :  { %397 = vmatprep.subr.bf16.mxu0 %v551_v0  ;;  %417 = vmatpush3.bf16.msra.mxu1 %v416_v29  ;;  %v422_v43 = vpack.c.bf16 %v187_v42, %v186_v41  ;;  %v425_v46 = vpack.c.bf16 %v189_v45, %v188_v44  ;;  %v190_v47 = vld [vmem:[#allocation7 + $0x40] sm:$0xff]  ;;  %v191_v48 = vld [vmem:[#allocation7 + $0x48] sm:$0xff]  ;;  %v192_v50 = vld [vmem:[#allocation7 + $0x50] sm:$0xff] }
  0x40   :  { %418 = vmatprep.subr.bf16.mxu1 %v551_v0  ;;  %v428_v49 = vpack.c.bf16 %v191_v48, %v190_v47  ;;  %v193_v51 = vld [vmem:[#allocation7 + $0x58] sm:$0xff]  ;;  %v194_v53 = vld [vmem:[#allocation7 + $0x60] sm:$0xff]  ;;  %v195_v54 = vld [vmem:[#allocation7 + $0x68] sm:$0xff] }
  0x41   :  { %v431_v52 = vpack.c.bf16 %v193_v51, %v192_v50  ;;  %v434_v55 = vpack.c.bf16 %v195_v54, %v194_v53  ;;  %v196_v56 = vld [vmem:[#allocation7 + $0x70] sm:$0xff]  ;;  %v197_v57 = vld [vmem:[#allocation7 + $0x78] sm:$0xff] }
  0x42   :  { %399 = vmatpush3.bf16.msra.mxu0 %v398_v10  ;;  %v437_v58 = vpack.c.bf16 %v197_v57, %v196_v56  ;;  %v285_v6 = vld [vmem:[%s663_s2] ss:$0 sm:$0xff] }
  0x43   :  { %400 = vmatprep.subr.bf16.mxu0 %v551_v0  ;;  %420 = vmatpush3.bf16.msra.mxu1 %v419_v40 }
  0x44   :  { %421 = vmatprep.subr.bf16.mxu1 %v551_v0 }
  0x46   :  { %402 = vmatpush3.bf16.msra.mxu0 %v401_v13 }
  0x47   :  { %403 = vmatprep.subr.bf16.mxu0 %v551_v0  ;;  %423 = vmatpush3.bf16.msra.mxu1 %v422_v43 }
  0x48   :  { %424 = vmatprep.subr.bf16.mxu1 %v551_v0 }
  0x4a   :  { %405 = vmatpush3.bf16.msra.mxu0 %v404_v16 }
  0x4b   :  { %406 = vmatprep.subr.bf16.mxu0 %v551_v0  ;;  %426 = vmatpush3.bf16.msra.mxu1 %v425_v46 }
  0x4c   :  { %427 = vmatprep.subr.bf16.mxu1 %v551_v0 }
  0x4e   :  { %408 = vmatpush3.bf16.msra.mxu0 %v407_v19 }
  0x4f   :  { %409 = vmatprep.subr.bf16.mxu0 %v551_v0  ;;  %429 = vmatpush3.bf16.msra.mxu1 %v428_v49 }
  0x50   :  { %430 = vmatprep.subr.bf16.mxu1 %v551_v0 }
  0x52   :  { %411 = vmatpush3.bf16.msra.mxu0 %v410_v22 }
  0x53   :  { %412 = vmatprep.subr.bf16.mxu0 %v551_v0  ;;  %432 = vmatpush3.bf16.msra.mxu1 %v431_v52 }
  0x54   :  { %433 = vmatprep.subr.bf16.mxu1 %v551_v0 }
  0x56   :  { %414 = vmatpush3.bf16.msra.mxu0 %v413_v25 }
  0x57   :  { %435 = vmatpush3.bf16.msra.mxu1 %v434_v55 }
  0x58   :  { %436 = vmatprep.subr.bf16.mxu1 %v551_v0  ;;  %v286_v0 = vld [vmem:[%s664_s3] ss:$0 sm:$0xff] }
  0x59   :  { %354 = vmatmul.mubr.f32.vlgmr.msra.gmra.mrb[0].mxu0 %v60_v26 }
  0x5b   :  { %438 = vmatpush3.bf16.msra.mxu1 %v437_v58 }
 0x12c   :  { %v143_v30 = vpop.f32.mrb[0].mxu0 }
 0x12d   :  { %v150_v31 = vmul.f32 0.70710677, %v143_v30  ;;  %v355_v32 = vpop.f32.mrb[1].mxu0  ;;  %v149_v34 = vmul.f32 0.5, %v143_v30 }
 0x12f   :  { %448 = verf.f32 %v150_v31 }
 0x139   :  { %v449_v33 = vpop.eup %448 }
 0x13a   :  { %v152_v35 = vadd.f32 1.0, %v449_v33 }
 0x13c   :  { %v153_v36 = vmul.f32 %v152_v35, %v149_v34 }
 0x13e   :  { %154 = vadd.xlane.f32.xlu0 %v153_v36  ;;  %v157_v37 = vmul.f32 %v153_v36, %v153_v36 }
 0x142   :  { %158 = vadd.xlane.f32.xlu0 %v157_v37 }
 0x1cb   :  { %v155_v59 = vpop.xlane.xlu0 %154 }
 0x1cc   :  { %v156_v60 = vmul.f32 0.015625, %v155_v59 }
 0x1ce   :  { %v161_v62 = vmul.f32 %v156_v60, %v156_v60  ;;  %v164_v4 = vsub.f32 %v153_v36, %v156_v60 }
 0x1cf   :  { %v159_v61 = vpop.xlane.xlu0 %158 }
 0x1d0   :  { %v160_v63 = vmul.f32 0.015625, %v159_v61 }
 0x1d2   :  { %v162_v1 = vsub.f32 %v160_v63, %v161_v62 }
 0x1d4   :  { %v163_v2 = vmax.f32 %v162_v1, 0.0 }
 0x1d6   :  { %v165_v3 = vadd.f32 1e-05, %v163_v2 }
 0x1d8   :  { %450 = vrsqrt.f32 %v165_v3 }
 0x1e2   :  { %v451_v5 = vpop.eup %450 }
 0x1e3   :  { %v167_v7 = vmul.f32 %v451_v5, %v164_v4 }
 0x1e5   :  { %v174_v8 = vmul.f32 %v285_v6, %v167_v7 }
 0x1e7   :  { %v181_v9 = vadd.f32 %v286_v0, %v174_v8 }
 0x1e9   :  { %389 = vmatmul.mubr.f32.vlgmr.msra.gmra.mrb[0].mxu1 %v181_v9 }
 0x2bc   :  { %v264_v10 = vpop.f32.mrb[0].mxu1 }
 0x2bd   :  { %268 = vst [vmem:[#allocation8] sm:$0xff] %v264_v10  ;;  %v390_v11 = vpop.f32.mrb[1].mxu1 }
 0x2be   :  { %529 = shalt.err (!%p526_p0)
}
 0x2bf   :  { %s530_s3 = scalar_lea.hbm %s666_s5, 128 }
 0x2c0   :  { %p531_p1 = scmp.ne.s32.totalorder %s666_s5, %s530_s3  ;;  %p534_p2 = scmp.lt.u32.totalorder %s530_s3, %s666_s5 }
 0x2c2   :  { %p536_p3 = pnand %p534_p2, %p531_p1 }
 0x2c4   :  { %539 = shalt.err (!%p536_p3)
}
 0x2c5   :  { %278 = dma.vmem_to_hbm [thread:$0]  %s276_s8, 128, %s666_s5, [#allocation4]  }
 0x2c6   :  { %544 = dma.done.wait [#allocation4], 128  }
 0x2c7   :  { %545 = vsyncadd [#allocation4], 4294967168 }
 0x2c8   :  { %282 = vsyncpa [#allocation3], 1 }
 0x2c9   :  { %283 = vsyncpa [#allocation6], 1 }
 0x2ca   :  { %284 = vsyncpa [#allocation4], 1 }

// kernel: tpu_custom_call.1
= control target key start
LH: loop header
LB: loop body
LE: loop exit
PB: predicated region body
PF: predicated region fallthrough
CT: control target
= control target key end

     0   :  { %10 = vsyncpa [#allocation3], 0  ;;  %s661_s0 = inlined_call_operand.hbm [shape: f32[8,128], index: 0, kind: input, shape index: {}]   ;;  %s662_s1 = inlined_call_operand.hbm [shape: f32[128,128], index: 1, kind: input, shape index: {}]   ;;  %s663_s2 = inlined_call_operand.vmem [shape: f32[1,128], index: 2, kind: input, shape index: {}]   ;;  %s664_s3 = inlined_call_operand.vmem [shape: f32[1,128], index: 3, kind: input, shape index: {}]   ;;  %s665_s4 = inlined_call_operand.hbm [shape: f32[128,128], index: 4, kind: input, shape index: {}]   ;;  %s666_s5 = inlined_call_operand.hbm [shape: f32[8,128], index: 5, kind: output, shape index: {}]  }
   0x1   :  { %11 = vsyncpa [#allocation6], 0 }
   0x2   :  { %12 = vsyncpa [#allocation4], 0  ;;  %s546_s18 = smov [#allocation5]   ;;  %s452_s22 = scalar_lea.hbm %s662_s1, 2048 }
   0x3   :  { %s28_s19 = sshll.u32 %s546_s18, 4  ;;  %p453_p0 = scmp.ne.s32.totalorder %s662_s1, %s452_s22  ;;  %s29_s19 = int_to_ptr.vmem [resolvable:$true] %s28_s19 }
   0x4   :  { %p456_p1 = scmp.lt.u32.totalorder %s452_s22, %s662_s1 }
   0x6   :  { %p458_p2 = pnand %p456_p1, %p453_p0 }
   0x8   :  { %461 = shalt.err (!%p458_p2)
}
   0x9   :  { %s462_s27 = scalar_lea.vmem %s29_s19, 2048  ;;  %p467_p4 = scmp.lt.s32.totalorder %s29_s19, %s29_s19 }
   0xa   :  { %p463_p3 = scmp.ne.s32.totalorder %s29_s19, %s462_s27  ;;  %p468_p5 = scmp.lt.s32.totalorder %s462_s27, %s462_s27 }
   0xc   :  { %p469_p6 = por %p468_p5, %p467_p4 }
   0xe   :  { %p470_p7 = pnand %p469_p6, %p463_p3 }
  0x10   :  { %473 = shalt.err (!%p470_p7)
}
  0x11   :  { %s547_s28 = smov 128   ;;  %s548_s29 = smov 8  }
  0x12   :  { %34 = dma.hbm_to_vmem [thread:$0]  %s662_s1, 2048, %s29_s19, [#allocation6], %s547_s28, %s547_s28, %s548_s29  }
  0x13   :  { %s549_s7 = smov [#allocation2]   ;;  %s550_s9 = smov [#allocation7]  }
  0x14   :  { %s19_s8 = sshll.u32 %s549_s7, 4  ;;  %s44_s10 = sshll.u32 %s550_s9, 4  ;;  %s20_s8 = int_to_ptr.vmem [resolvable:$true] %s19_s8  ;;  %s45_s10 = int_to_ptr.vmem [resolvable:$true] %s44_s10 }
  0x15   :  { %s474_s13 = scalar_lea.hbm %s661_s0, 128 }
  0x16   :  { %p475_p8 = scmp.ne.s32.totalorder %s661_s0, %s474_s13  ;;  %p478_p9 = scmp.lt.u32.totalorder %s474_s13, %s661_s0 }
  0x18   :  { %p480_p10 = pnand %p478_p9, %p475_p8 }
  0x1a   :  { %483 = shalt.err (!%p480_p10)
}
  0x1b   :  { %s484_s1 = scalar_lea.vmem %s20_s8, 128  ;;  %p489_p12 = scmp.lt.s32.totalorder %s20_s8, %s20_s8 }
  0x1c   :  { %p485_p11 = scmp.ne.s32.totalorder %s20_s8, %s484_s1  ;;  %p490_p13 = scmp.lt.s32.totalorder %s484_s1, %s484_s1 }
  0x1e   :  { %p491_p0 = por %p490_p13, %p489_p12 }
  0x20   :  { %p492_p1 = pnand %p491_p0, %p485_p11 }
  0x22   :  { %495 = shalt.err (!%p492_p1)
}
  0x23   :  { %22 = dma.hbm_to_vmem [thread:$0]  %s661_s0, 128, %s20_s8, [#allocation3]  }
  0x24   :  { %s496_s22 = scalar_lea.hbm %s665_s4, 2048 }
  0x25   :  { %p497_p2 = scmp.ne.s32.totalorder %s665_s4, %s496_s22  ;;  %p500_p3 = scmp.lt.u32.totalorder %s496_s22, %s665_s4 }
  0x27   :  { %p502_p4 = pnand %p500_p3, %p497_p2 }
  0x29   :  { %505 = shalt.err (!%p502_p4)
}
  0x2a   :  { %s506_s27 = scalar_lea.vmem %s45_s10, 2048  ;;  %p511_p6 = scmp.lt.s32.totalorder %s45_s10, %s45_s10 }
  0x2b   :  { %p507_p5 = scmp.ne.s32.totalorder %s45_s10, %s506_s27  ;;  %p512_p7 = scmp.lt.s32.totalorder %s506_s27, %s506_s27 }
  0x2d   :  { %p513_p8 = por %p512_p7, %p511_p6 }
  0x2f   :  { %p514_p9 = pnand %p513_p8, %p507_p5 }
  0x31   :  { %517 = shalt.err (!%p514_p9)
}
  0x32   :  { %50 = dma.hbm_to_vmem [thread:$0]  %s665_s4, 2048, %s45_s10, [#allocation6], %s547_s28, %s547_s28, %s548_s29  }
  0x33   :  { %540 = dma.done.wait [#allocation3], 128  }
  0x34   :  { %541 = vsyncadd [#allocation3], 4294967168 }
  0x35   :  { %542 = dma.done.wait [#allocation6], 4096  }
  0x36   :  { %543 = vsyncadd [#allocation6], 4294963200  ;;  %v551_v0 = vmov 0.0|0.0   ;;  %vm552_vm0 = vmmov 0   ;;  %v553_v1 = vmov 0.0   ;;  %v61_v2 = vld [vmem:[#allocation5] sm:$0xff] }
  0x37   :  { %391 = vmatprep.subr.bf16.mxu0 %v551_v0  ;;  %353 = vmatprep.mubr.msk.f32.mxu0 %vm552_vm0, %v553_v1  ;;  %v62_v3 = vld [vmem:[#allocation5 + $0x8] sm:$0xff]  ;;  %v63_v4 = vld [vmem:[#allocation5 + $0x10] sm:$0xff]  ;;  %v64_v6 = vld [vmem:[#allocation5 + $0x18] sm:$0xff]  ;;  %s554_s7 = smov [#allocation8]  }
  0x38   :  { %415 = vmatprep.subr.bf16.mxu1 %v551_v0  ;;  %388 = vmatprep.mubr.msk.f32.mxu1 %vm552_vm0, %v553_v1  ;;  %v392_v5 = vpack.c.bf16 %v62_v3, %v61_v2  ;;  %v395_v7 = vpack.c.bf16 %v64_v6, %v63_v4  ;;  %v65_v8 = vld [vmem:[#allocation5 + $0x20] sm:$0xff]  ;;  %v66_v9 = vld [vmem:[#allocation5 + $0x28] sm:$0xff]  ;;  %v67_v11 = vld [vmem:[#allocation5 + $0x30] sm:$0xff]  ;;  %s275_s8 = sshll.u32 %s554_s7, 4  ;;  %s276_s8 = int_to_ptr.vmem [resolvable:$true] %s275_s8 }
  0x39   :  { %v398_v10 = vpack.c.bf16 %v66_v9, %v65_v8  ;;  %v68_v12 = vld [vmem:[#allocation5 + $0x38] sm:$0xff]  ;;  %v69_v14 = vld [vmem:[#allocation5 + $0x40] sm:$0xff]  ;;  %v70_v15 = vld [vmem:[#allocation5 + $0x48] sm:$0xff]  ;;  %s518_s9 = scalar_lea.vmem %s276_s8, 128  ;;  %p523_p11 = scmp.lt.s32.totalorder %s276_s8, %s276_s8 }
  0x3a   :  { %393 = vmatpush3.bf16.msra.mxu0 %v392_v5  ;;  %v401_v13 = vpack.c.bf16 %v68_v12, %v67_v11  ;;  %v404_v16 = vpack.c.bf16 %v70_v15, %v69_v14  ;;  %v71_v17 = vld [vmem:[#allocation5 + $0x50] sm:$0xff]  ;;  %v72_v18 = vld [vmem:[#allocation5 + $0x58] sm:$0xff]  ;;  %v73_v20 = vld [vmem:[#allocation5 + $0x60] sm:$0xff]  ;;  %p519_p10 = scmp.ne.s32.totalorder %s276_s8, %s518_s9  ;;  %p524_p12 = scmp.lt.s32.totalorder %s518_s9, %s518_s9 }
  0x3b   :  { %394 = vmatprep.subr.bf16.mxu0 %v551_v0  ;;  %v407_v19 = vpack.c.bf16 %v72_v18, %v71_v17  ;;  %v74_v21 = vld [vmem:[#allocation5 + $0x68] sm:$0xff]  ;;  %v75_v23 = vld [vmem:[#allocation5 + $0x70] sm:$0xff]  ;;  %v76_v24 = vld [vmem:[#allocation5 + $0x78] sm:$0xff] }
  0x3c   :  { %v410_v22 = vpack.c.bf16 %v74_v21, %v73_v20  ;;  %v413_v25 = vpack.c.bf16 %v76_v24, %v75_v23  ;;  %v60_v26 = vld [vmem:[#allocation2] sm:$0xff]  ;;  %v182_v27 = vld [vmem:[#allocation7] sm:$0xff]  ;;  %v183_v28 = vld [vmem:[#allocation7 + $0x8] sm:$0xff]  ;;  %p525_p13 = por %p524_p12, %p523_p11 }
  0x3d   :  { %v416_v29 = vpack.c.bf16 %v183_v28, %v182_v27  ;;  %v184_v38 = vld [vmem:[#allocation7 + $0x10] sm:$0xff]  ;;  %v185_v39 = vld [vmem:[#allocation7 + $0x18] sm:$0xff]  ;;  %v186_v41 = vld [vmem:[#allocation7 + $0x20] sm:$0xff] }
  0x3e   :  { %396 = vmatpush3.bf16.msra.mxu0 %v395_v7  ;;  %v419_v40 = vpack.c.bf16 %v185_v39, %v184_v38  ;;  %v187_v42 = vld [vmem:[#allocation7 + $0x28] sm:$0xff]  ;;  %v188_v44 = vld [vmem:[#allocation7 + $0x30] sm:$0xff]  ;;  %v189_v45 = vld [vmem:[#allocation7 + $0x38] sm:$0xff]  ;;  %p526_p0 = pnand %p525_p13, %p519_p10 }
  0x3f   :  { %397 = vmatprep.subr.bf16.mxu0 %v551_v0  ;;  %417 = vmatpush3.bf16.msra.mxu1 %v416_v29  ;;  %v422_v43 = vpack.c.bf16 %v187_v42, %v186_v41  ;;  %v425_v46 = vpack.c.bf16 %v189_v45, %v188_v44  ;;  %v190_v47 = vld [vmem:[#allocation7 + $0x40] sm:$0xff]  ;;  %v191_v48 = vld [vmem:[#allocation7 + $0x48] sm:$0xff]  ;;  %v192_v50 = vld [vmem:[#allocation7 + $0x50] sm:$0xff] }
  0x40   :  { %418 = vmatprep.subr.bf16.mxu1 %v551_v0  ;;  %v428_v49 = vpack.c.bf16 %v191_v48, %v190_v47  ;;  %v193_v51 = vld [vmem:[#allocation7 + $0x58] sm:$0xff]  ;;  %v194_v53 = vld [vmem:[#allocation7 + $0x60] sm:$0xff]  ;;  %v195_v54 = vld [vmem:[#allocation7 + $0x68] sm:$0xff] }
  0x41   :  { %v431_v52 = vpack.c.bf16 %v193_v51, %v192_v50  ;;  %v434_v55 = vpack.c.bf16 %v195_v54, %v194_v53  ;;  %v196_v56 = vld [vmem:[#allocation7 + $0x70] sm:$0xff]  ;;  %v197_v57 = vld [vmem:[#allocation7 + $0x78] sm:$0xff] }
  0x42   :  { %399 = vmatpush3.bf16.msra.mxu0 %v398_v10  ;;  %v437_v58 = vpack.c.bf16 %v197_v57, %v196_v56  ;;  %v285_v6 = vld [vmem:[%s663_s2] ss:$0 sm:$0xff] }
  0x43   :  { %400 = vmatprep.subr.bf16.mxu0 %v551_v0  ;;  %420 = vmatpush3.bf16.msra.mxu1 %v419_v40 }
  0x44   :  { %421 = vmatprep.subr.bf16.mxu1 %v551_v0 }
  0x46   :  { %402 = vmatpush3.bf16.msra.mxu0 %v401_v13 }
  0x47   :  { %403 = vmatprep.subr.bf16.mxu0 %v551_v0  ;;  %423 = vmatpush3.bf16.msra.mxu1 %v422_v43 }
  0x48   :  { %424 = vmatprep.subr.bf16.mxu1 %v551_v0 }
  0x4a   :  { %405 = vmatpush3.bf16.msra.mxu0 %v404_v16 }
  0x4b   :  { %406 = vmatprep.subr.bf16.mxu0 %v551_v0  ;;  %426 = vmatpush3.bf16.msra.mxu1 %v425_v46 }
  0x4c   :  { %427 = vmatprep.subr.bf16.mxu1 %v551_v0 }
  0x4e   :  { %408 = vmatpush3.bf16.msra.mxu0 %v407_v19 }
  0x4f   :  { %409 = vmatprep.subr.bf16.mxu0 %v551_v0  ;;  %429 = vmatpush3.bf16.msra.mxu1 %v428_v49 }
  0x50   :  { %430 = vmatprep.subr.bf16.mxu1 %v551_v0 }
  0x52   :  { %411 = vmatpush3.bf16.msra.mxu0 %v410_v22 }
  0x53   :  { %412 = vmatprep.subr.bf16.mxu0 %v551_v0  ;;  %432 = vmatpush3.bf16.msra.mxu1 %v431_v52 }
  0x54   :  { %433 = vmatprep.subr.bf16.mxu1 %v551_v0 }
  0x56   :  { %414 = vmatpush3.bf16.msra.mxu0 %v413_v25 }
  0x57   :  { %435 = vmatpush3.bf16.msra.mxu1 %v434_v55 }
  0x58   :  { %436 = vmatprep.subr.bf16.mxu1 %v551_v0  ;;  %v286_v0 = vld [vmem:[%s664_s3] ss:$0 sm:$0xff] }
  0x59   :  { %354 = vmatmul.mubr.f32.vlgmr.msra.gmra.mrb[0].mxu0 %v60_v26 }
  0x5b   :  { %438 = vmatpush3.bf16.msra.mxu1 %v437_v58 }
 0x12c   :  { %v143_v30 = vpop.f32.mrb[0].mxu0 }
 0x12d   :  { %v150_v31 = vmul.f32 0.70710677, %v143_v30  ;;  %v355_v32 = vpop.f32.mrb[1].mxu0  ;;  %v149_v34 = vmul.f32 0.5, %v143_v30 }
 0x12f   :  { %448 = verf.f32 %v150_v31 }
 0x139   :  { %v449_v33 = vpop.eup %448 }
 0x13a   :  { %v152_v35 = vadd.f32 1.0, %v449_v33 }
 0x13c   :  { %v153_v36 = vmul.f32 %v152_v35, %v149_v34 }
 0x13e   :  { %154 = vadd.xlane.f32.xlu0 %v153_v36  ;;  %v157_v37 = vmul.f32 %v153_v36, %v153_v36 }
 0x142   :  { %158 = vadd.xlane.f32.xlu0 %v157_v37 }
 0x1cb   :  { %v155_v59 = vpop.xlane.xlu0 %154 }
 0x1cc   :  { %v156_v60 = vmul.f32 0.015625, %v155_v59 }
 0x1ce   :  { %v161_v62 = vmul.f32 %v156_v60, %v156_v60  ;;  %v164_v4 = vsub.f32 %v153_v36, %v156_v60 }
 0x1cf   :  { %v159_v61 = vpop.xlane.xlu0 %158 }
 0x1d0   :  { %v160_v63 = vmul.f32 0.015625, %v159_v61 }
 0x1d2   :  { %v162_v1 = vsub.f32 %v160_v63, %v161_v62 }
 0x1d4   :  { %v163_v2 = vmax.f32 %v162_v1, 0.0 }
 0x1d6   :  { %v165_v3 = vadd.f32 1e-05, %v163_v2 }
 0x1d8   :  { %450 = vrsqrt.f32 %v165_v3 }
 0x1e2   :  { %v451_v5 = vpop.eup %450 }
 0x1e3   :  { %v167_v7 = vmul.f32 %v451_v5, %v164_v4 }
 0x1e5   :  { %v174_v8 = vmul.f32 %v285_v6, %v167_v7 }
 0x1e7   :  { %v181_v9 = vadd.f32 %v286_v0, %v174_v8 }
 0x1e9   :  { %389 = vmatmul.mubr.f32.vlgmr.msra.gmra.mrb[0].mxu1 %v181_v9 }
 0x2bc   :  { %v264_v10 = vpop.f32.mrb[0].mxu1 }
 0x2bd   :  { %268 = vst [vmem:[#allocation8] sm:$0xff] %v264_v10  ;;  %v390_v11 = vpop.f32.mrb[1].mxu1 }
 0x2be   :  { %529 = shalt.err (!%p526_p0)
}
 0x2bf   :  { %s530_s3 = scalar_lea.hbm %s666_s5, 128 }
 0x2c0   :  { %p531_p1 = scmp.ne.s32.totalorder %s666_s5, %s530_s3  ;;  %p534_p2 = scmp.lt.u32.totalorder %s530_s3, %s666_s5 }
 0x2c2   :  { %p536_p3 = pnand %p534_p2, %p531_p1 }
 0x2c4   :  { %539 = shalt.err (!%p536_p3)
}
 0x2c5   :  { %278 = dma.vmem_to_hbm [thread:$0]  %s276_s8, 128, %s666_s5, [#allocation4]  }
 0x2c6   :  { %544 = dma.done.wait [#allocation4], 128  }
 0x2c7   :  { %545 = vsyncadd [#allocation4], 4294967168 }
 0x2c8   :  { %282 = vsyncpa [#allocation3], 1 }
 0x2c9   :  { %283 = vsyncpa [#allocation6], 1 }
 0x2ca   :  { %284 = vsyncpa [#allocation4], 1 }

</bundles_post_ra>
